<compile_context>
chip_gen: v7x
topology: tpu7x:2x2x1
jax: 0.10.0
libtpu: 0.0.40
codegen_flags: <defaults>
</compile_context>

<pallas_src>
import functools

import jax
import jax.numpy as jnp
from jax.experimental import pallas as pl
from jax.experimental.pallas import tpu as pltpu

_BN_EPS = 1e-5
# Explicit scoped-VMEM budget: comfortably below v7x's 64 MiB physical VMEM, equal to the
# v6e/v7x scoped default, safe on v5e (128 MiB physical). Block sizes are chosen so the
# double-buffered working set stays far below this.
_VMEM_LIMIT_BYTES = 32 * 1024 * 1024


# --------------------------------------------------------------------------------------------
# Pass 1: dilated causal conv (one MXU matmul) + partial BatchNorm statistics per row block.
# --------------------------------------------------------------------------------------------
def _conv_stats_kernel(x3_ref, w_ref, y_ref, stats_ref):
    """x3_ref   : (rows, 3*C_in)   causally shifted taps stacked on lanes (built in wrapper)
       w_ref    : (3*C_in, c_tile) fused conv weight (taps stacked on rows)
       y_ref    : (rows, c_tile)   conv output (f32, pre-BN) -> HBM for pass 2
       stats_ref: (8, c_tile)      row 0 = sum(y), row 1 = sum(y*y), rows 2..7 zero padding"""
    yc = jnp.dot(x3_ref[...], w_ref[...], preferred_element_type=jnp.float32)
    y_ref[...] = yc
    s = jnp.sum(yc, axis=0, keepdims=True)
    ss = jnp.sum(yc * yc, axis=0, keepdims=True)
    pad = jnp.zeros((6, yc.shape[1]), jnp.float32)
    stats_ref[...] = jnp.concatenate([s, ss, pad], axis=0)


# --------------------------------------------------------------------------------------------
# Pass 2: folded BatchNorm affine + ELU + MaxPool1d(kernel=3, stride=2, padding=1).
# --------------------------------------------------------------------------------------------
def _norm_pool_kernel(y_ref, scale_ref, offset_ref, o_ref, *, l_out):
    """y_ref  : (rows, c_tile)   conv output; rows = whole batch elements, so pooling windows
                                 never cross the block boundary
       scale_ref / offset_ref : (1, c_tile) folded BN scale / offset
       o_ref  : (rows//2, c_tile) pooled output (lane-dense)"""
    rows = y_ref.shape[0]
    half = rows // 2
    sc = scale_ref[...]
    of = offset_ref[...]
    # Even / odd input positions straight from the VMEM block (strided loads) -> no full-size
    # window-max scratch and no stride-2 writeback round trip.
    ye = y_ref[pl.ds(0, half, stride=2), :] * sc + of
    yo = y_ref[pl.ds(1, half, stride=2), :] * sc + of
    # ELU (alpha = 1).  (exp(x)-1 form; precision delta vs expm1 is far below tolerance.)
    ae = jnp.where(ye > 0, ye, jnp.exp(ye) - 1.0)
    ao = jnp.where(yo > 0, yo, jnp.exp(yo) - 1.0)
    # MaxPool window at output j is {in[2j-1], in[2j], in[2j+1]} = {previous odd, even, odd}.
    ap = pltpu.roll(ao, shift=1, axis=0)                           # XLU rotate, not VPU copies
    pos = jax.lax.broadcasted_iota(jnp.int32, (half, 1), 0) % l_out
    ap = jnp.where(pos == 0, -jnp.inf, ap)                         # pool left pad / batch start
    o_ref[...] = jnp.maximum(ae, jnp.maximum(ao, ap))


# --------------------------------------------------------------------------------------------
# Wrapper
# --------------------------------------------------------------------------------------------
def _choose_batches_per_block(B, L, C, c_tile, itemsize):
    """Row blocks are whole batch elements (so pooling never needs a halo).
    Constraints: bpb | B; (bpb*L) % 16 == 0 so both the (rows, c) and (rows//2, c) blocks are
    8-sublane aligned (unless the block covers the whole array); keep >= 2 row blocks when the
    channel axis alone cannot feed v7x's 2 TensorCores; cap the block at a few MiB so the
    double-buffered pipeline fits comfortably in v7x's 64 MiB VMEM."""
    per_row_bytes = 3 * C * itemsize + 2 * c_tile * 4          # x3 block + f32 y block (pass 1)
    row_cap = max(L, (8 << 20) // max(per_row_bytes, 1))
    need_two = (C <= c_tile) and (B > 1)
    cands = [b for b in range(1, B + 1)
             if B % b == 0
             and ((b * L) % 16 == 0 or b == B)
             and not (need_two and b > B // 2)]
    if not cands:
        return B                                                # degenerate shapes: one block
    pick = cands[0]
    target_rows = min(row_cap, max(512, L))                     # ~512 rows: good DMA efficiency
    for b in cands:
        if b * L <= target_rows:
            pick = b
    return pick


def conv_layer_forward(x, weight, bias, gamma, beta, dilation, *,
                       c_tile=None, batches_per_block=None, matmul_dtype=jnp.bfloat16):
    """x: (B, L, C) float -> (B, L//2, C), matching ConvLayer.forward (training-mode BatchNorm).

    matmul_dtype: MXU input dtype for the conv (f32 accumulation either way).  bf16 is native
    on v5e/v6e/v7x and ~3x faster through the MXU; pass jnp.float32 for bit-closer numerics.
    """
    B, L, C = x.shape
    if L % 2 != 0:
        raise NotImplementedError("even sequence length required")   # TODO(synk): odd L
    Lout = L // 2
    N = B * L
    d = int(dilation)

    # Channel tile: 256 feeds the full v6e/v7x MXU width (only when >= 2 such tiles remain so
    # the channel axis can still shard across v7x's TensorCores); v5e's 128-wide MXU is happy
    # with 128; small C falls back to C.
    if c_tile is None:
        if C % 256 == 0 and C // 256 >= 2:
            c_tile = 256
        elif C % 128 == 0 and C > 128:
            c_tile = 128
        else:
            c_tile = C
    assert C % c_tile == 0
    num_c = C // c_tile

    itemsize = jnp.dtype(matmul_dtype).itemsize
    if batches_per_block is None:
        batches_per_block = _choose_batches_per_block(B, L, C, c_tile, itemsize)
    bpb = batches_per_block
    assert B % bpb == 0
    num_r = B // bpb
    rows = bpb * L
    rows_out = bpb * Lout

    # ---- Hoisted (grid-invariant) tap stacking: x3[:, k*C:(k+1)*C] = x shifted by (2-k)*d rows
    # within each batch element (zero causal padding).  Built once in XLA, so every kernel row
    # block is self-contained and the in-kernel conv is a single matmul with K = 3*C_in.
    xp = jnp.pad(x, ((0, 0), (2 * d, 0), (0, 0)))
    x3 = jnp.concatenate([xp[:, k * d:k * d + L, :] for k in range(3)], axis=-1)
    x3 = x3.reshape(N, 3 * C).astype(matmul_dtype)
    # Conv weight (C_out, C_in, 3) -> (3*C_in, C_out), taps stacked on rows to match x3.
    wf = jnp.transpose(weight, (2, 1, 0)).reshape(3 * C, C).astype(matmul_dtype)
    # Conv bias: a per-channel constant shift is removed exactly by training-mode BatchNorm, so
    # it cannot change the forward output -> folded out of the hot path (kept in the signature
    # for interface parity; it would only matter for the running-stat buffers, see TODO above).
    del bias

    # ---- Pass 1: conv + partial BN statistics per (row block, channel tile).
    conv_cost = pl.CostEstimate(
        flops=2 * N * 3 * C * C,
        transcendentals=0,
        bytes_accessed=N * 3 * C * itemsize + 3 * C * C * itemsize + N * C * 4
        + num_r * 8 * C * 4)
    y, stats = pl.pallas_call(
        _conv_stats_kernel,
        out_shape=(jax.ShapeDtypeStruct((N, C), jnp.float32),
                   jax.ShapeDtypeStruct((num_r * 8, C), jnp.float32)),
        grid=(num_r, num_c),
        in_specs=[
            pl.BlockSpec((rows, 3 * C), lambda r, j: (r, 0)),
            pl.BlockSpec((3 * C, c_tile), lambda r, j: (0, j)),
        ],
        out_specs=(
            pl.BlockSpec((rows, c_tile), lambda r, j: (r, j)),
            pl.BlockSpec((8, c_tile), lambda r, j: (r, j)),
        ),
        compiler_params=pltpu.CompilerParams(
            dimension_semantics=("parallel", "parallel"),
            vmem_limit_bytes=_VMEM_LIMIT_BYTES),
        cost_estimate=conv_cost,
    )(x3, wf)

    # ---- Tiny cross-row-block reduction + BN affine folding (a few KB of plain XLA work).
    stats = stats.reshape(num_r, 8, C)
    mean = jnp.sum(stats[:, 0, :], axis=0) / N
    var = jnp.maximum(jnp.sum(stats[:, 1, :], axis=0) / N - mean * mean, 0.0)
    inv_std = jax.lax.rsqrt(var + _BN_EPS)
    scale = (gamma * inv_std).astype(jnp.float32).reshape(1, C)
    offset = (beta - mean * gamma * inv_std).astype(jnp.float32).reshape(1, C)

    # ---- Pass 2: folded BN + ELU + MaxPool, lane-dense (B*Lout, C) output.
    pool_cost = pl.CostEstimate(
        flops=8 * N * C,
        transcendentals=N * C,
        bytes_accessed=N * C * 4 + (N // 2) * C * 4 + 2 * C * 4)
    out2 = pl.pallas_call(
        functools.partial(_norm_pool_kernel, l_out=Lout),
        out_shape=jax.ShapeDtypeStruct((B * Lout, C), jnp.float32),
        grid=(num_r, num_c),
        in_specs=[
            pl.BlockSpec((rows, c_tile), lambda r, j: (r, j)),
            pl.BlockSpec((1, c_tile), lambda r, j: (0, j)),
            pl.BlockSpec((1, c_tile), lambda r, j: (0, j)),
        ],
        out_specs=pl.BlockSpec((rows_out, c_tile), lambda r, j: (r, j)),
        compiler_params=pltpu.CompilerParams(
            dimension_semantics=("parallel", "parallel"),
            vmem_limit_bytes=_VMEM_LIMIT_BYTES),
        cost_estimate=pool_cost,
    )(y, scale, offset)

    return out2.reshape(B, Lout, C)                      # free row-major reshape


# --------------------------------------------------------------------------------------------
# Pure-JAX reference of ConvLayer.forward (same semantics, includes the conv bias explicitly).
# --------------------------------------------------------------------------------------------
def conv_layer_reference(x, weight, bias, gamma, beta, dilation):
    B, L, C = x.shape
    d = dilation
    xn = jnp.transpose(x, (0, 2, 1))
    xp = jnp.pad(xn, ((0, 0), (0, 0), (2 * d, 0)))
    y = jnp.zeros((B, C, L), jnp.float32)
    for k in range(3):
        y = y + jnp.einsum('oi,bil->bol', weight[:, :, k], xp[:, :, k * d:k * d + L])
    y = y + bias[None, :, None]
    mean = jnp.mean(y, axis=(0, 2), keepdims=True)
    var = jnp.mean((y - mean) ** 2, axis=(0, 2), keepdims=True)
    yn = (y - mean) / jnp.sqrt(var + _BN_EPS) * gamma[None, :, None] + beta[None, :, None]
    ya = jnp.where(yn > 0, yn, jnp.exp(yn) - 1.0)
    Lout = (L + 2 - 3) // 2 + 1
    ypad = jnp.pad(ya, ((0, 0), (0, 0), (1, 1)), constant_values=-jnp.inf)
    wm = jnp.maximum(jnp.maximum(ypad[:, :, 0:L], ypad[:, :, 1:L + 1]), ypad[:, :, 2:L + 2])
    out = wm[:, :, 0:2 * Lout:2]
    return jnp.transpose(out, (0, 2, 1))


if __name__ == "__main__":
    def make_inputs(key, B, L, C):
        kx, kw, kb, kg, kbe = jax.random.split(key, 5)
        x = jax.random.normal(kx, (B, L, C), dtype=jnp.float32)
        weight = 0.3 * jax.random.normal(kw, (C, C, 3), dtype=jnp.float32)   # Conv1d weight
        bias = 0.1 * jax.random.normal(kb, (C,), dtype=jnp.float32)          # Conv1d bias
        gamma = 1.0 + 0.1 * jax.random.normal(kg, (C,), dtype=jnp.float32)   # BN weight
        beta = 0.1 * jax.random.normal(kbe, (C,), dtype=jnp.float32)         # BN bias
        return x, weight, bias, gamma, beta

    configs = [
        # (B, L, C, dilation) — small shapes exercising multiple row blocks / channel tiles.
        (2, 16, 4, 2),     # primary: 2 row blocks, 1 channel tile (f32 + default bf16 paths)
        (4, 16, 8, 1),     # 2 row blocks, dilation 1
        (2, 16, 256, 1),   # 2 channel tiles of 128 (exercises the channel grid axis)
    ]
    keys = jax.random.split(jax.random.PRNGKey(0), len(configs))
    for idx, (cfg_key, (B, L, C, d)) in enumerate(zip(keys, configs)):
        x, weight, bias, gamma, beta = make_inputs(cfg_key, B, L, C)
        ref = conv_layer_reference(x, weight, bias, gamma, beta, d)

        out_f32 = conv_layer_forward(x, weight, bias, gamma, beta, d,
                                     matmul_dtype=jnp.float32)
        out_f32 = jax.block_until_ready(out_f32)
        assert out_f32.shape == ref.shape, (out_f32.shape, ref.shape)
        assert jnp.allclose(out_f32, ref, rtol=1e-4, atol=1e-4), \
            f"f32 mismatch vs reference (config {idx})"

        if idx == 0:   # also exercise the default bf16 MXU path (f32 accumulate)
            out_bf16 = conv_layer_forward(x, weight, bias, gamma, beta, d)
            out_bf16 = jax.block_until_ready(out_bf16)
            assert jnp.allclose(out_bf16, ref, rtol=3e-2, atol=3e-2), \
                "bf16 mismatch vs reference"

    print("KERNEL_OK")
</pallas_src>

<mosaic_0001>
module attributes {stable_mosaic.version = 11 : i64} {
  func.func @_conv_stats_kernel(%arg0: i32, %arg1: i32, %arg2: memref<16x12xf32, #tpu.memory_space<vmem>>, %arg3: memref<12x4xf32, #tpu.memory_space<vmem>>, %arg4: memref<16x4xf32, #tpu.memory_space<vmem>>, %arg5: memref<8x4xf32, #tpu.memory_space<vmem>>) attributes {dimension_semantics = [#tpu.dimension_semantics<parallel>, #tpu.dimension_semantics<parallel>], iteration_bounds = array<i64: 2, 1>, scalar_prefetch = 0 : i64, scratch_operands = 0 : i64, tpu.core_type = #tpu.core_type<tc>, window_params = [{transform_indices = @transform_0, window_bounds = array<i64: 16, 12>}, {transform_indices = @transform_1, window_bounds = array<i64: 12, 4>}, {transform_indices = @transform_2, window_bounds = array<i64: 16, 4>}, {transform_indices = @transform_3, window_bounds = array<i64: 8, 4>}]} {
    %c0 = arith.constant 0 : index
    %c0_0 = arith.constant 0 : index
    %0 = vector.load %arg2[%c0, %c0_0] : memref<16x12xf32, #tpu.memory_space<vmem>>, vector<16x12xf32>
    %c0_1 = arith.constant 0 : index
    %c0_2 = arith.constant 0 : index
    %1 = vector.load %arg3[%c0_1, %c0_2] : memref<12x4xf32, #tpu.memory_space<vmem>>, vector<12x4xf32>
    %cst = arith.constant dense<0.000000e+00> : vector<16x4xf32>
    %2 = tpu.matmul %0, %1, %cst {dimension_numbers = #tpu.dot_dimension_numbers<[1], [0], [0], [1], [0, 0, 1, 1], [], []>} : vector<16x12xf32>, vector<12x4xf32>, vector<16x4xf32> -> vector<16x4xf32>
    %c0_3 = arith.constant 0 : index
    %c0_4 = arith.constant 0 : index
    %3 = vector.load %arg4[%c0_3, %c0_4] : memref<16x4xf32, #tpu.memory_space<vmem>>, vector<16x4xf32>
    tpu.vector_store %arg4[%c0_3, %c0_4], %2 {strides = array<i32>} : memref<16x4xf32, #tpu.memory_space<vmem>>, vector<16x4xf32>,
    %cst_5 = arith.constant dense<0.000000e+00> : vector<4xf32>
    %4 = vector.multi_reduction <add>, %2, %cst_5 [0] : vector<16x4xf32> to vector<4xf32>
    %5 = vector.shape_cast %4 : vector<4xf32> to vector<1x4xf32>
    %6 = arith.mulf %2, %2 : vector<16x4xf32>
    %cst_6 = arith.constant dense<0.000000e+00> : vector<4xf32>
    %7 = vector.multi_reduction <add>, %6, %cst_6 [0] : vector<16x4xf32> to vector<4xf32>
    %8 = vector.shape_cast %7 : vector<4xf32> to vector<1x4xf32>
    %cst_7 = arith.constant 0.000000e+00 : f32
    %9 = vector.broadcast %cst_7 : f32 to vector<6x4xf32>
    %10 = tpu.concatenate %5, %8, %9 in 0 : vector<1x4xf32>, vector<1x4xf32>, vector<6x4xf32> -> vector<8x4xf32>
    %c0_8 = arith.constant 0 : index
    %c0_9 = arith.constant 0 : index
    %11 = vector.load %arg5[%c0_8, %c0_9] : memref<8x4xf32, #tpu.memory_space<vmem>>, vector<8x4xf32>
    tpu.vector_store %arg5[%c0_8, %c0_9], %10 {strides = array<i32>} : memref<8x4xf32, #tpu.memory_space<vmem>>, vector<8x4xf32>,
    return
  }
  func.func @transform_0(%arg0: i32, %arg1: i32) -> (i32, i32) {
    %c0_i32 = arith.constant 0 : i32
    %c0_i32_0 = arith.constant 0 : i32
    return %arg0, %c0_i32 : i32, i32
  }
  func.func @transform_1(%arg0: i32, %arg1: i32) -> (i32, i32) {
    %c0_i32 = arith.constant 0 : i32
    %c0_i32_0 = arith.constant 0 : i32
    return %c0_i32, %arg1 : i32, i32
  }
  func.func @transform_2(%arg0: i32, %arg1: i32) -> (i32, i32) {
    %c0_i32 = arith.constant 0 : i32
    return %arg0, %arg1 : i32, i32
  }
  func.func @transform_3(%arg0: i32, %arg1: i32) -> (i32, i32) {
    %c0_i32 = arith.constant 0 : i32
    return %arg0, %arg1 : i32, i32
  }
}

</mosaic_0001>

<bundles_post_ra>
// kernel: tpu_custom_call.1
= control target key start
LH: loop header
LB: loop body
LE: loop exit
PB: predicated region body
PF: predicated region fallthrough
CT: control target
= control target key end

     0   :  { %s582_s12 = smov 0   ;;  %s584_s13 = smov 0   ;;  %s636_s0 = inlined_call_operand.vmem [shape: f32[32,12], index: 0, kind: input, shape index: {}]   ;;  %s637_s1 = inlined_call_operand.vmem [shape: f32[12,4], index: 1, kind: input, shape index: {}]   ;;  %s638_s2 = inlined_call_operand.vmem [shape: f32[32,4], index: 2, kind: output, shape index: {0}]   ;;  %s639_s3 = inlined_call_operand.vmem [shape: f32[16,4], index: 3, kind: output, shape index: {1}]  }
   0x1   :  { %s586_s14 = smov 0  }
   0x2 LB: > { %s26_s15 = sadd.s32 1, %s555_s13  ;;  %p484_p0 = scmp.ge.s32.totalorder %s559_s14, 1  ;;  %s559_s14 = sphi %s586_s14, %s14_s14   ;;  %s555_s13 = sphi %s584_s13, %s641_s13   ;;  %s551_s12 = sphi %s582_s12, %s640_s12  }
   0x3   : > { %p28_p1 = scmp.ge.s32.totalorder %s26_s15, 2  ;;  %p166_p2 = scmp.lt.s32.totalorder %s559_s14, 3 }
   0x5   : > { %s643_s15 = smov (%p28_p1, %s26_s15), 0  ;;  %p167_p3 = pnand %p484_p0, %p166_p2 }
   0x6   : > { %v232_v0 = vld [vmem:[%s637_s1] sm:$0xff] (!%p167_p3)  ;;  %v233_v1 = vld [vmem:[%s637_s1 + $0x8] sm:$0xf] (!%p167_p3)  ;;  %vm241_vm0 = vcmask (!%p167_p3), 1043456   ;;  %s485_s20 = sshll.u32 (!%p167_p3), %s551_s12, 1  ;;  %vm561_vm1 = vmmov (!%p167_p3), 1  }
   0x7   : > { %170 = sbr.rel (%p167_p3) target bundleno = 252 (0xfc), region = 28  ;;  %v506_v2 = vpack.c.bf16 (!%p167_p3), %v233_v1, %v232_v0  ;;  %vm507_vm2 = vmpackc.low (!%p167_p3), %vm241_vm0, %vm561_vm1  ;;  %p205_p4 = scmp.lt.s32.totalorder (!%p167_p3), %s485_s20, 3  ;;  %vm234_vm3 = vcmask (!%p167_p3), 97280   ;;  %vm320_vm4 = vcmask (!%p167_p3), 31744   ;;  %vm343_vm5 = vcmask (!%p167_p3), 1040384  }
   0x8   : > { %p223_p5 = scmp.lt.s32.totalorder (!%p167_p3), %s551_s12, 1  ;;  %vm345_vm6 = vcmask (!%p167_p3), 1041408  }
   0x9   : > { %508 = vmatprep.subr.msk.bf16.mxu0 (!%p167_p3), %vm507_vm2, %v506_v2 }
   0xa   : > { %511 = vmatpush3.bf16.msk.msra.mxu0 (!%p167_p3), %vm507_vm2, %v506_v2 }
   0xe   : > { %s645_s20 = smov (!%p205_p4, %s485_s20), 3  ;;  %s647_s12 = smov (!%p223_p5, %s551_s12), 1 }
   0xf   : > { %s486_s21 = sshll.u32 %s645_s20, 3  ;;  %s489_s28 = sshll.u32 %s647_s12, 3 }
  0x10   : > { %s208_s24 = scalar_lea.vmem %s636_s0, %s486_s21  ;;  %s221_s27 = scalar_lea.vmem %s638_s2, %s486_s21 }
  0x11   : > { %v230_v3 = vld [vmem:[%s208_s24] sm:$0xff]  ;;  %v231_v4 = vld [vmem:[%s208_s24 + $0x8] sm:$0xff]  ;;  %s229_s4 = scalar_lea.vmem %s639_s3, %s489_s28 }
  0x12   : > { %503 = vmatprep.mubr.msk.f32.mxu0 %vm234_vm3, %v230_v3 }
  0x13   : > { %504 = vmatmul.mubr.msk.f32.vlgmr.msra.gmra.mrb[0].mxu0 %vm234_vm3, %v231_v4 }
  0xe6   : > { %v505_v5 = vpop.f32.mrb[0].mxu0 }
  0xe7   : > { %v324_v6 = vsel %vm320_vm4, %v505_v5, 0.0  ;;  %v333_v7 = vmul.f32 %v505_v5, %v505_v5  ;;  %v311_v8 = vpop.f32.mrb[1].mxu0  ;;  %322 = vst.msk [vmem:[%s221_s27 + $0x8] sm:$0xff] %vm320_vm4, %v505_v5 }
  0xe8   : > { %321 = vst.msk [vmem:[%s221_s27] sm:$0xff] %vm320_vm4, %v311_v8  ;;  %v323_v9 = vsel %vm320_vm4, %v311_v8, 0.0  ;;  %v332_v10 = vmul.f32 %v311_v8, %v311_v8 }
  0xe9   : > { %v335_v11 = vsel %vm320_vm4, %v333_v7, 0.0  ;;  %v325_v12 = vadd.f32 %v324_v6, %v323_v9 }
  0xea   : > { %v334_v13 = vsel %vm320_vm4, %v332_v10, 0.0 }
  0xeb   : > { %v326_v14 = vrot.slane %v325_v12, 4  ;;  %v336_v15 = vadd.f32 %v335_v11, %v334_v13 }
  0xed   : > { %v327_v16 = vadd.f32 %v326_v14, %v325_v12  ;;  %v337_v17 = vrot.slane %v336_v15, 4 }
  0xef   : > { %v328_v18 = vrot.slane %v327_v16, 2  ;;  %v338_v19 = vadd.f32 %v337_v17, %v336_v15 }
  0xf1   : > { %v329_v20 = vadd.f32 %v328_v18, %v327_v16  ;;  %v339_v21 = vrot.slane %v338_v19, 2 }
  0xf3   : > { %v330_v22 = vrot.slane %v329_v20, 1  ;;  %v340_v23 = vadd.f32 %v339_v21, %v338_v19 }
  0xf5   : > { %v341_v24 = vrot.slane %v340_v23, 1  ;;  %v331_v25 = vadd.f32 %v330_v22, %v329_v20 }
  0xf7   : > { %v342_v26 = vadd.f32 %v341_v24, %v340_v23 }
  0xf9   : > { %v344_v27 = vsel %vm343_vm5, %v331_v25, %v342_v26 }
  0xfa   : > { %v346_v28 = vsel %vm345_vm6, %v344_v27, 0.0 }
  0xfb   : > { %347 = vst.msk [vmem:[%s229_s4] sm:$0xff] %vm320_vm4, %v346_v28 }
  0xfc PF: > { %s14_s14 = sadd.s32 1, %s559_s14   ;;  %s640_s12 = smov %s555_s13 }
  0xfd   : > { %p11_p6 = scmp.ge.s32.totalorder %s14_s14, 4   ;;  %s641_s13 = smov %s643_s15 }
  0xff   :  { %13 = sbr.rel (!%p11_p6) target bundleno = 2 (0x2), region = 73 }

</bundles_post_ra>
